<compile_context>
chip_gen: v5e
topology: v5e:2x2
jax: 0.10.0
libtpu: 0.0.40
codegen_flags: <defaults>
</compile_context>

<pallas_src>
import numpy as np
import jax
import jax.numpy as jnp
from jax.experimental import pallas as pl
from jax.experimental.pallas import tpu as pltpu

SIZES = (1, 2, 3, 6)   # AdaptiveAvgPool2d output sizes, one per channel group


# --------------------------- operator construction (host glue) ---------------------------
def _pool_matrix(in_dim, out_dim):
    """P[o, i]: adaptive average pooling (out_dim <- in_dim), PyTorch semantics."""
    P = np.zeros((out_dim, in_dim), dtype=np.float64)
    for o in range(out_dim):
        lo = (o * in_dim) // out_dim
        hi = int(np.ceil((o + 1) * in_dim / out_dim))
        P[o, lo:hi] = 1.0 / (hi - lo)
    return P


def _interp_matrix(in_dim, out_dim):
    """I[o, i]: 1-D bilinear interpolation (out_dim <- in_dim), align_corners=True."""
    I = np.zeros((out_dim, in_dim), dtype=np.float64)
    for o in range(out_dim):
        src = 0.0 if (out_dim == 1 or in_dim == 1) else o * (in_dim - 1) / (out_dim - 1)
        i0 = min(int(np.floor(src)), in_dim - 1)
        i1 = min(i0 + 1, in_dim - 1)
        frac = src - i0
        I[o, i0] += 1.0 - frac
        I[o, i1] += frac
    return I


def _factored_operators(H, W, hw_pad, s2_pad, dtype, sizes=SIZES):
    """Low-rank factorization of the fused pool->upsample operator.

    Returns
      PT: (4, H*W, s2_pad)   so that  y   = x_flat @ PT[g]   (adaptive avg-pool)
      IT: (4, s2_pad, hw_pad) so that out = y @ IT[g]        (bilinear upsample)
    Padded columns/rows are zero, so padded intermediate/output entries are exact zeros.
    """
    HW = H * W
    pts, its = [], []
    for s in sizes:
        Ph = _pool_matrix(H, s)            # (s, H)
        Pw = _pool_matrix(W, s)            # (s, W)
        Ih = _interp_matrix(s, H)          # (H, s)
        Iw = _interp_matrix(s, W)          # (W, s)
        P = np.kron(Ph, Pw)                # (s*s, H*W):  pooled_flat = P @ x_flat
        I = np.kron(Ih, Iw)                # (H*W, s*s):  out_flat   = I @ pooled_flat
        pt = np.zeros((HW, s2_pad), dtype=np.float64)
        pt[:, :s * s] = P.T
        it = np.zeros((s2_pad, hw_pad), dtype=np.float64)
        it[:s * s, :HW] = I.T
        pts.append(pt)
        its.append(it)
    return (jnp.asarray(np.stack(pts), dtype=dtype),
            jnp.asarray(np.stack(its), dtype=dtype))


# ----------------------------------- tiling heuristics -----------------------------------
def _vmem_limit_bytes():
    """Generation-aware scoped VMEM limit: ~75% of per-core capacity (conservative default)."""
    cap = 64 * 1024 * 1024                      # v7x per-core VMEM = smallest in the fleet
    try:
        cap = int(getattr(pltpu.get_tpu_info(), "vmem_capacity_bytes", cap))
    except Exception:
        pass
    return int(min(cap * 3 // 4, 96 * 1024 * 1024))


def _block_budget_bytes(vmem_limit):
    """Per-grid-step bytes for (x tile + out tile); double-buffered total << vmem_limit."""
    return max(2 << 20, min(8 << 20, vmem_limit // 6))


def _largest_batch_tile(N, per_row_bytes, budget):
    for d in sorted({d for d in range(1, N + 1) if N % d == 0}, reverse=True):
        if d * per_row_bytes <= budget:
            return d
    return 1


def _choose_tiles(N, Cg, hw_in, hw_out, itemsize, align, budget):
    """Pick (tn, tc) for blocks (tn, tc, hw_in) / (tn, tc, hw_out), maximizing rows = tn*tc.

    tc is Cg (always layout-legal) or an `align`-multiple divisor of Cg; tn divides N.
    tn > 1 is only allowed when tc is align-aligned, so the in-kernel (tn,tc,HW) ->
    (tn*tc,HW) merge is layout-free (no sublane relayout copies).
    """
    per_row = (hw_in + hw_out) * itemsize
    tc_opts = sorted({Cg} | {d for d in range(align, Cg, align) if Cg % d == 0},
                     reverse=True)
    tn_opts = sorted({d for d in range(1, N + 1) if N % d == 0}, reverse=True)
    best = None
    for tc in tc_opts:
        for tn in (tn_opts if tc % align == 0 else [1]):
            rows = tn * tc
            if rows * per_row <= budget:
                if best is None or rows > best[0]:
                    best = (rows, tn, tc)
                break                              # tn_opts descending: first fit is largest
    if best is None:                               # nothing under the soft budget
        return 1, min(tc_opts)                     # validated against vmem_limit by caller
    return best[1], best[2]


# --------------------------------------- kernel ------------------------------------------
def _lowpass_kernel(x_ref, pt_ref, it_ref, o_ref):
    # x_ref: (tn, tc, HW) or (rows, HW)      one tile of one channel group
    # pt_ref: (HW, S2P)   pooling operator (transposed), zero-padded columns
    # it_ref: (S2P, HWp)  upsample operator (transposed), zero-padded rows/columns
    # o_ref:  same leading dims as x_ref, last dim HWp (lane-dense)
    x = x_ref[...]
    if x.ndim == 3:                                # tc sublane-aligned -> free merge
        tn, tc, hw = x.shape
        x = x.reshape(tn * tc, hw)
    # adaptive avg-pool:    (rows, HW) @ (HW, S2P) -> (rows, S2P)
    y = jnp.dot(x, pt_ref[...], preferred_element_type=jnp.float32)
    # bilinear upsample:    (rows, S2P) @ (S2P, HWp) -> (rows, HWp)
    z = jnp.dot(y.astype(it_ref.dtype), it_ref[...], preferred_element_type=jnp.float32)
    z = jnp.maximum(z, 0.0)                        # ReLU
    o_ref[...] = z.reshape(o_ref.shape).astype(o_ref.dtype)


# -------------------------------------- wrapper -------------------------------------------
def lowpass_module(x):
    """x: (N, C, H, W), C divisible by 4.  Returns (N, C, H, W) matching LowPassModule."""
    N, C, H, W = x.shape
    assert C % 4 == 0, "in_channel must be divisible by 4"
    Cg = C // 4
    HW = H * W
    HWp = ((HW + 127) // 128) * 128                # lane-dense output last dim
    S2P = max(s * s for s in SIZES)                # padded rank of the factorization (36)

    op_dtype = x.dtype if x.dtype == jnp.bfloat16 else jnp.float32
    pt, it = _factored_operators(H, W, HWp, S2P, op_dtype)   # (4,HW,S2P), (4,S2P,HWp)

    itemsize = np.dtype(x.dtype).itemsize
    align = 16 if itemsize == 2 else 8
    vmem_limit = _vmem_limit_bytes()
    budget = _block_budget_bytes(vmem_limit)

    xv = x.reshape(N, 4, Cg, HW)                   # free contiguous reshape, NO transpose

    if Cg == 1:
        tn = _largest_batch_tile(N, (HW + HWp) * itemsize, budget)
        tc = 1
        grid = (4, N // tn)
        blk_in, blk_out = (tn, None, None, HW), (tn, None, None, HWp)
        x_map = lambda g, ni: (ni, g, 0, 0)
        op_map = lambda g, ni: (g, 0, 0)
        sem = ("parallel", "parallel")
    else:
        tn, tc = _choose_tiles(N, Cg, HW, HWp, itemsize, align, budget)
        grid = (4, N // tn, Cg // tc)
        if tn == 1:                                # squeeze N -> 2-D tile, no relayout
            blk_in, blk_out = (None, None, tc, HW), (None, None, tc, HWp)
        else:                                      # tc is align-aligned -> free merge
            blk_in, blk_out = (tn, None, tc, HW), (tn, None, tc, HWp)
        x_map = lambda g, ni, ci: (ni, g, ci, 0)
        op_map = lambda g, ni, ci: (g, 0, 0)
        sem = ("parallel", "parallel", "parallel")

    # Validate the (double-buffered) resident footprint against the scoped VMEM limit.
    rows = tn * tc
    op_itemsize = np.dtype(op_dtype).itemsize
    resident = (2 * rows * (HW + HWp) * itemsize
                + 2 * (HW * S2P + S2P * HWp) * op_itemsize)
    if resident > vmem_limit:
        raise NotImplementedError(
            "lowpass_module: minimal tile does not fit the VMEM budget for this shape")

    out = pl.pallas_call(
        _lowpass_kernel,
        out_shape=jax.ShapeDtypeStruct((N, 4, Cg, HWp), x.dtype),
        grid_spec=pltpu.PrefetchScalarGridSpec(
            num_scalar_prefetch=0,
            grid=grid,
            in_specs=[pl.BlockSpec(blk_in, x_map),
                      pl.BlockSpec((None, HW, S2P), op_map),
                      pl.BlockSpec((None, S2P, HWp), op_map)],
            out_specs=pl.BlockSpec(blk_out, x_map),
        ),
        compiler_params=pltpu.CompilerParams(
            dimension_semantics=sem,
            vmem_limit_bytes=vmem_limit,
        ),
    )(xv, pt, it)

    if HWp != HW:
        out = out[..., :HW]                        # drop lane padding
    return out.reshape(N, C, H, W)                 # free reshape back to NCHW


# -------------------------- independent numpy reference (check) ---------------------------
def _ref_lowpass(x_np):
    N, C, H, W = x_np.shape
    Cg = C // 4
    outs = []
    for g, s in enumerate(SIZES):
        xg = x_np[:, g * Cg:(g + 1) * Cg].astype(np.float64)
        pooled = np.zeros((N, Cg, s, s), dtype=np.float64)
        for oh in range(s):
            h0 = (oh * H) // s
            h1 = int(np.ceil((oh + 1) * H / s))
            for ow in range(s):
                w0 = (ow * W) // s
                w1 = int(np.ceil((ow + 1) * W / s))
                pooled[:, :, oh, ow] = xg[:, :, h0:h1, w0:w1].mean(axis=(2, 3))
        up = np.zeros((N, Cg, H, W), dtype=np.float64)
        for oh in range(H):
            sh = 0.0 if (H == 1 or s == 1) else oh * (s - 1) / (H - 1)
            h0 = int(np.floor(sh)); h1 = min(h0 + 1, s - 1); fh = sh - h0
            for ow in range(W):
                sw = 0.0 if (W == 1 or s == 1) else ow * (s - 1) / (W - 1)
                w0 = int(np.floor(sw)); w1 = min(w0 + 1, s - 1); fw = sw - w0
                up[:, :, oh, ow] = (
                    pooled[:, :, h0, w0] * (1 - fh) * (1 - fw)
                    + pooled[:, :, h0, w1] * (1 - fh) * fw
                    + pooled[:, :, h1, w0] * fh * (1 - fw)
                    + pooled[:, :, h1, w1] * fh * fw)
        outs.append(up)
    return np.maximum(np.concatenate(outs, axis=1), 0.0).astype(np.float32)


if __name__ == "__main__":
    key = jax.random.PRNGKey(0)
    x = jax.random.normal(key, (2, 4, 16, 16), dtype=jnp.float32)

    out = lowpass_module(x)
    jax.block_until_ready(out)

    ref = _ref_lowpass(np.asarray(x))
    np.testing.assert_allclose(np.asarray(out), ref, rtol=1e-4, atol=1e-4)
    print("KERNEL_OK")
</pallas_src>

<mosaic_0001>
module attributes {stable_mosaic.version = 11 : i64} {
  func.func @_lowpass_kernel(%arg0: i32, %arg1: i32, %arg2: memref<2x1x1x256xf32, #tpu.memory_space<vmem>>, %arg3: memref<1x256x36xf32, #tpu.memory_space<vmem>>, %arg4: memref<1x36x256xf32, #tpu.memory_space<vmem>>, %arg5: memref<2x1x1x256xf32, #tpu.memory_space<vmem>>) attributes {dimension_semantics = [#tpu.dimension_semantics<parallel>, #tpu.dimension_semantics<parallel>], iteration_bounds = array<i64: 4, 1>, scalar_prefetch = 0 : i64, scratch_operands = 0 : i64, tpu.core_type = #tpu.core_type<tc>, window_params = [{transform_indices = @transform_0, window_bounds = array<i64: 2, 1, 1, 256>}, {transform_indices = @transform_1, window_bounds = array<i64: 1, 256, 36>}, {transform_indices = @transform_2, window_bounds = array<i64: 1, 36, 256>}, {transform_indices = @transform_3, window_bounds = array<i64: 2, 1, 1, 256>}]} {
    %c0 = arith.constant 0 : index
    %c0_0 = arith.constant 0 : index
    %c0_1 = arith.constant 0 : index
    %c0_2 = arith.constant 0 : index
    %0 = vector.load %arg2[%c0, %c0_0, %c0_1, %c0_2] : memref<2x1x1x256xf32, #tpu.memory_space<vmem>>, vector<2x1x1x256xf32>
    %1 = vector.shape_cast %0 : vector<2x1x1x256xf32> to vector<2x256xf32>
    %c0_3 = arith.constant 0 : index
    %c0_4 = arith.constant 0 : index
    %c0_5 = arith.constant 0 : index
    %2 = vector.load %arg3[%c0_3, %c0_4, %c0_5] : memref<1x256x36xf32, #tpu.memory_space<vmem>>, vector<1x256x36xf32>
    %3 = vector.shape_cast %2 : vector<1x256x36xf32> to vector<256x36xf32>
    %cst = arith.constant dense<0.000000e+00> : vector<2x36xf32>
    %4 = tpu.matmul %1, %3, %cst {dimension_numbers = #tpu.dot_dimension_numbers<[1], [0], [0], [1], [0, 0, 1, 1], [], []>} : vector<2x256xf32>, vector<256x36xf32>, vector<2x36xf32> -> vector<2x36xf32>
    %c0_6 = arith.constant 0 : index
    %c0_7 = arith.constant 0 : index
    %c0_8 = arith.constant 0 : index
    %5 = vector.load %arg4[%c0_6, %c0_7, %c0_8] : memref<1x36x256xf32, #tpu.memory_space<vmem>>, vector<1x36x256xf32>
    %6 = vector.shape_cast %5 : vector<1x36x256xf32> to vector<36x256xf32>
    %cst_9 = arith.constant dense<0.000000e+00> : vector<2x256xf32>
    %7 = tpu.matmul %4, %6, %cst_9 {dimension_numbers = #tpu.dot_dimension_numbers<[1], [0], [0], [1], [0, 0, 1, 1], [], []>} : vector<2x36xf32>, vector<36x256xf32>, vector<2x256xf32> -> vector<2x256xf32>
    %cst_10 = arith.constant 0.000000e+00 : f32
    %8 = vector.broadcast %cst_10 : f32 to vector<2x256xf32>
    %9 = arith.maximumf %7, %8 : vector<2x256xf32>
    %c0_11 = arith.constant 0 : index
    %c0_12 = arith.constant 0 : index
    %c0_13 = arith.constant 0 : index
    %c0_14 = arith.constant 0 : index
    %10 = vector.load %arg5[%c0_11, %c0_12, %c0_13, %c0_14] : memref<2x1x1x256xf32, #tpu.memory_space<vmem>>, vector<2x1x1x256xf32>
    %11 = vector.shape_cast %10 : vector<2x1x1x256xf32> to vector<2x256xf32>
    %12 = vector.shape_cast %9 : vector<2x256xf32> to vector<2x1x1x256xf32>
    tpu.vector_store %arg5[%c0_11, %c0_12, %c0_13, %c0_14], %12 {strides = array<i32>} : memref<2x1x1x256xf32, #tpu.memory_space<vmem>>, vector<2x1x1x256xf32>,
    return
  }
  func.func @transform_0(%arg0: i32, %arg1: i32) -> (i32, i32, i32, i32) {
    %c0_i32 = arith.constant 0 : i32
    %c0_i32_0 = arith.constant 0 : i32
    %c0_i32_1 = arith.constant 0 : i32
    return %arg1, %arg0, %c0_i32, %c0_i32_0 : i32, i32, i32, i32
  }
  func.func @transform_1(%arg0: i32, %arg1: i32) -> (i32, i32, i32) {
    %c0_i32 = arith.constant 0 : i32
    %c0_i32_0 = arith.constant 0 : i32
    %c0_i32_1 = arith.constant 0 : i32
    return %arg0, %c0_i32, %c0_i32_0 : i32, i32, i32
  }
  func.func @transform_2(%arg0: i32, %arg1: i32) -> (i32, i32, i32) {
    %c0_i32 = arith.constant 0 : i32
    %c0_i32_0 = arith.constant 0 : i32
    %c0_i32_1 = arith.constant 0 : i32
    return %arg0, %c0_i32, %c0_i32_0 : i32, i32, i32
  }
  func.func @transform_3(%arg0: i32, %arg1: i32) -> (i32, i32, i32, i32) {
    %c0_i32 = arith.constant 0 : i32
    %c0_i32_0 = arith.constant 0 : i32
    %c0_i32_1 = arith.constant 0 : i32
    return %arg1, %arg0, %c0_i32, %c0_i32_0 : i32, i32, i32, i32
  }
}

</mosaic_0001>

<bundles_post_ra>
// kernel: tpu_custom_call.1
= control target key start
LH: loop header
LB: loop body
LE: loop exit
PB: predicated region body
PF: predicated region fallthrough
CT: control target
= control target key end

     0   :  { %8 = vsyncpa [#allocation4], 0  ;;  %s901_s0 = inlined_call_operand.vmem [shape: f32[2,4,1,256], index: 0, kind: input, shape index: {}]   ;;  %s902_s1 = inlined_call_operand.vmem [shape: f32[4,256,36], index: 1, kind: input, shape index: {}]   ;;  %s903_s2 = inlined_call_operand.vmem [shape: f32[4,36,256], index: 2, kind: input, shape index: {}]   ;;  %s904_s3 = inlined_call_operand.hbm [shape: f32[2,4,1,256], index: 3, kind: output, shape index: {}]  }
   0x1   :  { %10 = vsyncpa [#allocation4 + $0x1], 0  ;;  %s736_s12 = smov 0   ;;  %s738_s13 = smov 0  }
   0x2   :  { %s740_s14 = smov 0   ;;  %s742_s15 = smov 0  }
   0x3   :  { %s744_s16 = smov 0   ;;  %s746_s17 = smov 0  }
   0x4 LB: > { %s553_s18 = sadd.s32 4294967295, %s711_s17   ;;  %s554_s19 = sadd.s32 4294967294, %s711_s17   ;;  %s711_s17 = sphi %s746_s17, %s16_s17   ;;  %s707_s16 = sphi %s744_s16, %s911_s16   ;;  %s703_s15 = sphi %s742_s15, %s910_s15   ;;  %s699_s14 = sphi %s740_s14, %s909_s14   ;;  %s695_s13 = sphi %s738_s13, %s908_s13   ;;  %s691_s12 = sphi %s736_s12, %s907_s12  }
   0x5   : > { %s28_s20 = sadd.s32 1, %s707_s16  ;;  %s37_s21 = sadd.s32 1, %s699_s14 }
   0x6   : > { %p30_p0 = scmp.ge.s32.totalorder %s28_s20, 4  ;;  %p44_p1 = scmp.ne.s32.totalorder %s699_s14, %s695_s13 }
   0x7   : > { %p45_p2 = scmp.eq.s32.totalorder %s711_s17, 0  ;;  %p128_p3 = scmp.eq.s32.totalorder %s553_s18, 3 }
   0x8   : > { %s913_s20 = smov (%p30_p0, %s28_s20), 0  ;;  %p133_p6 = scmp.ne.s32.totalorder %s695_s13, %s691_s12 }
   0x9   : > { %p46_p4 = por %p45_p2, %p44_p1  ;;  %p775_p5 = por %p128_p3, %p44_p1 }
   0xa   : > { %s33_s23 = ssub.s32 %s707_s16, %s913_s20  ;;  %p134_p8 = scmp.eq.s32.totalorder %s554_s19, 3 }
   0xb   : > { %p35_p7 = scmp.eq.s32.totalorder %s33_s23, 0  ;;  %p556_p10 = scmp.ge.s32.totalorder %s711_s17, 4 }
   0xc   : > { %p786_p9 = por %p134_p8, %p133_p6 }
   0xd   : > { %s784_s24 = scalar_select %p35_p7, %s699_s14, %s37_s21  }
   0xe   : > { %150 = sbr.rel (%p556_p10) target bundleno = 25 (0x19), region = 16 }
  0x13   : > { %153 = sbr.rel (!%p46_p4) target bundleno = 25 (0x19), region = 20  ;;  %s155_s26 = sand.u32 (%p46_p4), 1, %s699_s14  }
  0x14   : > { %s558_s27 = sshll.u32 (%p46_p4), %s707_s16, 1  ;;  %s557_s28 = sshll.u32 (%p46_p4), %s155_s26, 2 }
  0x15   : > { %s162_s4 = scalar_lea.vmem (%p46_p4), %s901_s0, %s558_s27  ;;  %s157_s5 = scalar_lea.vmem (%p46_p4), [#allocation2], %s557_s28 }
  0x16   : > { %v179_v0 = vld [vmem:[%s162_s4] sm:$0x3] (%p46_p4)  ;;  %v181_v1 = vld [vmem:[%s162_s4 + $0x8] sm:$0x3] (%p46_p4) }
  0x17   : > { %180 = vst [vmem:[%s157_s5] sm:$0x3] (%p46_p4), %v179_v0 }
  0x18   : > { %182 = vst [vmem:[%s157_s5 + $0x2] sm:$0x3] %v181_v1 }
  0x19 PF: > { %p559_p11 = scmp.ge.s32.totalorder %s711_s17, 1  ;;  %p217_p12 = scmp.lt.s32.totalorder %s711_s17, 5 }
  0x1b   : > { %p218_p13 = pnand %p559_p11, %p217_p12 }
  0x1c   : > { %p258_p0 = scmp.lt.s32.totalorder (!%p218_p13), %s703_s15, 3  ;;  %s224_s6 = sand.u32 (!%p218_p13), 1, %s695_s13  }
  0x1d   : > { %221 = sbr.rel (%p218_p13) target bundleno = 343 (0x157), region = 62  ;;  %s802_s7 = sshll.u32 (!%p218_p13), %s224_s6, 2 }
  0x1e   : > { %s226_s10 = scalar_lea.vmem (!%p218_p13), [#allocation2], %s802_s7  ;;  %s570_s28 = sshll.u32 (!%p218_p13), %s703_s15, 1 }
  0x1f   : > { %s445_s4 = scalar_lea.hbm (!%p218_p13), %s904_s3, %s570_s28  ;;  %s256_s5 = scalar_lea.vmem (!%p218_p13), [#allocation3], %s802_s7 }
  0x22   : > { %s805_s8 = scalar_select %p258_p0, %s703_s15, 3  ;;  %v269_v2 = vld [vmem:[%s226_s10] sm:$0x3]  ;;  %v270_v3 = vld [vmem:[%s226_s10 + $0x2] sm:$0x3]  ;;  %vm366_vm0 = vcmask 1043456   ;;  %v425_v51 = vlaneseq }
  0x23   : > { %305 = vst [vmem:[#allocation1] ss:$9 sm:$0xff] %v269_v2  ;;  %vm362_vm1 = vcmask 293888   ;;  %vm418_vm2 = vcmask 1040384   ;;  %vm420_vm3 = vcmask 1041409   ;;  %s432_s15 = scalar_lea.sflag [#allocation4], %s224_s6 }
  0x24   : > { %s573_s9 = sshll.u32 %s805_s8, 8  ;;  %307 = vst [vmem:[#allocation1 + $0x1] ss:$9 sm:$0xff] %v270_v3  ;;  %s574_s21 = smul.u32 80, %s805_s8  ;;  %vm427_vm4 = vcmp.lt.s32.totalorder %v425_v51, 256 }
  0x25   : > { %s812_s19 = scalar_lea.vmem %s902_s1, %s573_s9  ;;  %s446_s8 = sshll.u32 %s256_s5, 4  ;;  %s447_s8 = int_to_ptr.vmem [resolvable:$true] %s446_s8 }
  0x26   : > { %v286_v4 = vld [vmem:[%s812_s19 + $0x78] sm:$0xff]  ;;  %v285_v6 = vld [vmem:[%s812_s19 + $0x70] sm:$0xff]  ;;  %v284_v8 = vld [vmem:[%s812_s19 + $0x68] sm:$0xff]  ;;  %s830_s27 = scalar_lea.vmem %s903_s2, %s574_s21  ;;  %s448_s9 = sshll.u32 %s445_s4, 4  ;;  %s449_s9 = int_to_ptr.hbm [resolvable:$true] %s448_s9 }
  0x27   : > { %v302_v5 = vld [vmem:[%s812_s19 + $0xf8] sm:$0xff]  ;;  %312 = vmatpush.msra.mxu0 %v286_v4  ;;  %v301_v7 = vld [vmem:[%s812_s19 + $0xf0] sm:$0xff]  ;;  %v300_v9 = vld [vmem:[%s812_s19 + $0xe8] sm:$0xff]  ;;  %s647_s10 = sshra.s32 %s449_s9, 4  ;;  %s648_s10 = int_to_ptr.hbm [resolvable:$true] %s647_s10 }
  0x28   : > { %332 = vmatpush.msra.mxu1 %v302_v5  ;;  %v283_v10 = vld [vmem:[%s812_s19 + $0x60] sm:$0xff]  ;;  %v282_v12 = vld [vmem:[%s812_s19 + $0x58] sm:$0xff]  ;;  %v281_v14 = vld [vmem:[%s812_s19 + $0x50] sm:$0xff]  ;;  %s649_s7 = scalar_lea.hbm %s648_s10, 4  ;;  %p654_p4 = scmp.lt.s32.totalorder %s648_s10, %s904_s3 }
  0x29   : > { %313 = vmatpush.msra.mxu0 %v285_v6  ;;  %v299_v11 = vld [vmem:[%s812_s19 + $0xe0] sm:$0xff]  ;;  %v298_v13 = vld [vmem:[%s812_s19 + $0xd8] sm:$0xff]  ;;  %v297_v15 = vld [vmem:[%s812_s19 + $0xd0] sm:$0xff]  ;;  %p650_p1 = scmp.ne.s32.totalorder %s648_s10, %s649_s7 }
  0x2a   : > { %333 = vmatpush.msra.mxu1 %v301_v7  ;;  %v280_v16 = vld [vmem:[%s812_s19 + $0x48] sm:$0xff]  ;;  %v279_v18 = vld [vmem:[%s812_s19 + $0x40] sm:$0xff]  ;;  %v358_v22 = vld [vmem:[%s830_s27 + $0x30] sm:$0xff] }
  0x2b   : > { %314 = vmatpush.msra.mxu0 %v284_v8  ;;  %v296_v17 = vld [vmem:[%s812_s19 + $0xc8] sm:$0xff]  ;;  %v360_v19 = vld [vmem:[%s830_s27 + $0x40] sm:$0xf]  ;;  %v359_v23 = vld [vmem:[%s830_s27 + $0x38] sm:$0xff]  ;;  %p651_p2 = pnand %p650_p1, %p775_p5 }
  0x2c   : > { %334 = vmatpush.msra.mxu1 %v300_v9  ;;  %v361_v20 = vld [vmem:[%s830_s27 + $0x48] sm:$0xf]  ;;  %v295_v21 = vld [vmem:[%s812_s19 + $0xc0] sm:$0xff]  ;;  %565 = vmatpush.msk.msra.mxu2 %vm366_vm0, %v360_v19  ;;  %v278_v26 = vld [vmem:[%s812_s19 + $0x38] sm:$0xff] }
  0x2d   : > { %315 = vmatpush.msra.mxu0 %v283_v10  ;;  %567 = vmatpush.msk.msra.mxu3 %vm366_vm0, %v361_v20  ;;  %v356_v24 = vld [vmem:[%s830_s27 + $0x20] sm:$0xff]  ;;  %v357_v25 = vld [vmem:[%s830_s27 + $0x28] sm:$0xff]  ;;  %v294_v27 = vld [vmem:[%s812_s19 + $0xb8] sm:$0xff]  ;;  %p652_p3 = pneg %p651_p2 }
  0x2e   : > { %335 = vmatpush.msra.mxu1 %v299_v11  ;;  %385 = vmatpush.msra.mxu2 %v358_v22  ;;  %v277_v28 = vld [vmem:[%s812_s19 + $0x30] sm:$0xff]  ;;  %v276_v30 = vld [vmem:[%s812_s19 + $0x28] sm:$0xff]  ;;  %v275_v32 = vld [vmem:[%s812_s19 + $0x20] sm:$0xff] }
  0x2f   : > { %316 = vmatpush.msra.mxu0 %v282_v12  ;;  %405 = vmatpush.msra.mxu3 %v359_v23  ;;  %v293_v29 = vld [vmem:[%s812_s19 + $0xb0] sm:$0xff]  ;;  %v292_v31 = vld [vmem:[%s812_s19 + $0xa8] sm:$0xff]  ;;  %v291_v33 = vld [vmem:[%s812_s19 + $0xa0] sm:$0xff] }
  0x30   : > { %336 = vmatpush.msra.mxu1 %v298_v13  ;;  %386 = vmatpush.msra.mxu2 %v356_v24  ;;  %v274_v34 = vld [vmem:[%s812_s19 + $0x18] sm:$0xff]  ;;  %v273_v36 = vld [vmem:[%s812_s19 + $0x10] sm:$0xff]  ;;  %v272_v38 = vld [vmem:[%s812_s19 + $0x8] sm:$0xff] }
  0x31   : > { %317 = vmatpush.msra.mxu0 %v281_v14  ;;  %406 = vmatpush.msra.mxu3 %v357_v25  ;;  %v290_v35 = vld [vmem:[%s812_s19 + $0x98] sm:$0xff]  ;;  %v289_v37 = vld [vmem:[%s812_s19 + $0x90] sm:$0xff]  ;;  %v288_v39 = vld [vmem:[%s812_s19 + $0x88] sm:$0xff] }
  0x32   : > { %337 = vmatpush.msra.mxu1 %v297_v15  ;;  %v271_v40 = vld [vmem:[%s812_s19] sm:$0xff]  ;;  %v309_v43 = vld [vmem:[#allocation1 + $0x9] sm:$0xff]  ;;  %v355_v45 = vld [vmem:[%s830_s27 + $0x18] sm:$0xff] }
  0x33   : > { %318 = vmatpush.msra.mxu0 %v280_v16  ;;  %v287_v41 = vld [vmem:[%s812_s19 + $0x80] sm:$0xff]  ;;  %v354_v44 = vld [vmem:[%s830_s27 + $0x10] sm:$0xff]  ;;  %407 = vmatpush.msra.mxu3 %v355_v45  ;;  %v353_v47 = vld [vmem:[%s830_s27 + $0x8] sm:$0xff]  ;;  %s653_s19 = scalar_lea.hbm %s904_s3, 16 }
  0x34   : > { %338 = vmatpush.msra.mxu1 %v296_v17  ;;  %v308_v42 = vld [vmem:[#allocation1] sm:$0xff]  ;;  %387 = vmatpush.msra.mxu2 %v354_v44  ;;  %p655_p6 = scmp.lt.s32.totalorder %s653_s19, %s649_s7 }
  0x35   : > { %319 = vmatpush.msra.mxu0 %v279_v18  ;;  %v352_v46 = vld [vmem:[%s830_s27] sm:$0xff]  ;;  %408 = vmatpush.msra.mxu3 %v353_v47 }
  0x36   : > { %339 = vmatpush.msra.mxu1 %v295_v21  ;;  %388 = vmatpush.msra.mxu2 %v352_v46  ;;  %p656_p7 = por %p655_p6, %p654_p4 }
  0x37   : > { %320 = vmatpush.msra.mxu0 %v278_v26 }
  0x38   : > { %340 = vmatpush.msra.mxu1 %v294_v27  ;;  %p657_p8 = pnand %p656_p7, %p652_p3 }
  0x39   : > { %321 = vmatpush.msra.mxu0 %v277_v28 }
  0x3a   : > { %341 = vmatpush.msra.mxu1 %v293_v29 }
  0x3b   : > { %322 = vmatpush.msra.mxu0 %v276_v30 }
  0x3c   : > { %342 = vmatpush.msra.mxu1 %v292_v31 }
  0x3d   : > { %323 = vmatpush.msra.mxu0 %v275_v32 }
  0x3e   : > { %343 = vmatpush.msra.mxu1 %v291_v33 }
  0x3f   : > { %324 = vmatpush.msra.mxu0 %v274_v34 }
  0x40   : > { %344 = vmatpush.msra.mxu1 %v290_v35 }
  0x41   : > { %325 = vmatpush.msra.mxu0 %v273_v36 }
  0x42   : > { %345 = vmatpush.msra.mxu1 %v289_v37 }
  0x43   : > { %326 = vmatpush.msra.mxu0 %v272_v38 }
  0x44   : > { %346 = vmatpush.msra.mxu1 %v288_v39 }
  0x45   : > { %327 = vmatpush.msra.mxu0 %v271_v40 }
  0x46   : > { %347 = vmatpush.msra.mxu1 %v287_v41  ;;  %328 = vmatmul.f32.vlgmr.msra.gmra.mxu0 %v308_v42 }
  0x47   : > { %348 = vmatmul.f32.vlgmr.msra.gmra.mxu1 %v309_v43 }
  0xc3   : > { %v329_v48 = vpop.f32.mrf.mxu0 }
  0xc4   : > { %v349_v49 = vpop.f32.mrf.mxu1 }
  0xc5   : > { %v350_v50 = vadd.f32 %v349_v49, %v329_v48 }
  0xc7   : > { %566 = vmatmul.msk.f32.vlgmr.msra.gmra.mxu2 %vm362_vm1, %v350_v50  ;;  %568 = vmatmul.msk.f32.vlgmr.msra.gmra.mxu3 %vm362_vm1, %v350_v50 }
 0x14a   : > { %v390_v52 = vpop.f32.mrf.mxu2  ;;  %v410_v53 = vpop.f32.mrf.mxu3 }
 0x14b   : > { %v414_v54 = vmax.f32 %v410_v53, 0.0  ;;  %v413_v55 = vmax.f32 %v390_v52, 0.0 }
 0x14d   : > { %v417_v56 = vrot.slane %v414_v54, 7 }
 0x14f   : > { %v419_v57 = vsel %vm418_vm2, %v413_v55, %v417_v56  ;;  %v421_v58 = vsel %vm420_vm3, %v413_v55, %v417_v56 }
 0x150   : > { %v422_v59 = vrot.slane %v421_v58, 1  ;;  %429 = vst.msk [vmem:[%s256_s5] sm:$0x3] %vm427_vm4, %v419_v57 }
 0x152   : > { %430 = vst.msk [vmem:[%s256_s5 + $0x2] sm:$0x3] %vm427_vm4, %v422_v59 }
 0x153   : > { %660 = shalt.err (!%p657_p8)
}
 0x154   : > { %s713_s6 = smov 32   ;;  %s714_s26 = smov 128  }
 0x155   : > { %s715_s27 = smov 2  }
 0x156   : > { %575 = dma.vmem_to_hbm [thread:$0]  (%p775_p5), %s447_s8, 64, %s449_s9, %s432_s15, %s713_s6, %s714_s26, %s715_s27  }
 0x157 PF: > { %p581_p10 = scmp.ge.s32.totalorder %s711_s17, 2  ;;  %s463_s28 = sand.u32 1, %s691_s12  }
 0x158   : > { %s464_s29 = scalar_lea.sflag [#allocation4], %s463_s28 }
 0x159   : > { %p578_p11 = pnand %p581_p10, %p786_p9 }
 0x15b   : > { %p579_p12 = pneg %p578_p11 }
 0x15d   : > { %686 = dma.done.wait (%p579_p12), %s464_s29, 64  }
 0x15e   : > { %688 = vsyncadd (%p579_p12), %s464_s29, 4294967232  ;;  %s16_s17 = sadd.s32 1, %s711_s17   ;;  %s907_s12 = smov %s695_s13 }
 0x15f   : > { %p13_p13 = scmp.ge.s32.totalorder %s16_s17, 6   ;;  %s908_s13 = smov %s699_s14 }
 0x160   : > { %s909_s14 = smov %s784_s24  ;;  %s910_s15 = smov %s707_s16 }
 0x161   : > { %s911_s16 = smov %s913_s20  ;;  %15 = sbr.rel (!%p13_p13) target bundleno = 4 (0x4), region = 113 }
 0x166   :  { %470 = vsyncpa [#allocation4], 1 }
 0x167   :  { %472 = vsyncpa [#allocation4 + $0x1], 1 }

</bundles_post_ra>
